<compile_context>
chip_gen: v6e
topology: v6e:2x2x1
jax: 0.10.0
libtpu: 0.0.40
codegen_flags: <defaults>
</compile_context>

<pallas_src>
import functools

import jax
import jax.numpy as jnp
from jax.experimental import pallas as pl
from jax.experimental.pallas import tpu as pltpu


# ----------------------------------------------------------------------------
# Pallas kernels
# ----------------------------------------------------------------------------
def _embed_layer1_kernel(label_ref, wT_ref, b_ref, latent_ref, w1_ref, o_ref):
    """Fused: emb = label @ W_emb^T + b ; x = emb * latent ; y = relu(x @ W1)."""
    emb = jnp.dot(label_ref[...], wT_ref[...],
                  preferred_element_type=jnp.float32) + b_ref[...]
    x = emb * latent_ref[...]
    y = jnp.dot(x, w1_ref[...], preferred_element_type=jnp.float32)
    o_ref[...] = jnp.maximum(y, 0.0).astype(o_ref.dtype)


def _parity_matmul_kernel(w_ref, x_ref, shift_ref, o_ref, *, act):
    """o = act(W @ X + shift);  W:(Cout,K) bf16, X:(K,tn) bf16, lane-dense out."""
    y = jnp.dot(w_ref[...], x_ref[...], preferred_element_type=jnp.float32)
    y = y + shift_ref[...]
    if act == "relu":
        y = jnp.maximum(y, 0.0)
    else:  # tanh
        y = jnp.tanh(y)
    o_ref[...] = y.astype(o_ref.dtype)


# ----------------------------------------------------------------------------
# Pallas wrappers
# ----------------------------------------------------------------------------
def embed_layer1(label, w_emb, b_emb, latent, w1):
    """label:(B,nc) w_emb:(L,nc) b_emb:(L,) latent:(B,L) w1:(L,Cout,4,4)
    -> (Cout, B, 4, 4) bf16 (internal C-major layout)."""
    B, L = latent.shape
    _, Cout, Kh, Kw = w1.shape
    wT = jnp.transpose(w_emb)                         # (nc, L)
    b = b_emb.reshape(1, L)
    w1mat = w1.reshape(L, Cout * Kh * Kw)             # columns: (co, kh, kw)
    vmem = pl.BlockSpec(memory_space=pltpu.MemorySpace.VMEM)
    y = pl.pallas_call(
        _embed_layer1_kernel,
        out_shape=jax.ShapeDtypeStruct((B, Cout * Kh * Kw), jnp.bfloat16),
        in_specs=[vmem] * 5,
        out_specs=vmem,
    )(label, wT, b, latent, w1mat)
    y = y.reshape(B, Cout, Kh, Kw)
    return jnp.transpose(y, (1, 0, 2, 3))             # (Cout, B, 4, 4)


def _pick_tile(M):
    """Largest lane tile that is a multiple of 128 and divides M (cap 2048)."""
    for tn in (2048, 1024, 512, 256, 128):
        if M % tn == 0:
            return tn
    return M  # full extent (M < 128 or awkward M)


def parity_matmul(wmat, xmat, shift, act, out_dtype):
    """wmat:(4,Cout,K) bf16, xmat:(4,K,M) bf16, shift:(Cout,1) f32
    -> (4,Cout,M) out_dtype.  Grid: (parity, M tiles), both parallel."""
    P, Cout, K = wmat.shape
    M = xmat.shape[2]
    tn = _pick_tile(M)
    kernel = functools.partial(_parity_matmul_kernel, act=act)
    return pl.pallas_call(
        kernel,
        out_shape=jax.ShapeDtypeStruct((P, Cout, M), out_dtype),
        grid=(P, M // tn),
        in_specs=[
            pl.BlockSpec((None, Cout, K), lambda p, j: (p, 0, 0)),
            pl.BlockSpec((None, K, tn), lambda p, j: (p, 0, j)),
            pl.BlockSpec((Cout, 1), lambda p, j: (0, 0)),
        ],
        out_specs=pl.BlockSpec((None, Cout, tn), lambda p, j: (p, 0, j)),
        compiler_params=pltpu.CompilerParams(
            dimension_semantics=("parallel", "parallel")),
    )(wmat, xmat, shift)


# ----------------------------------------------------------------------------
# Layer glue: parity-decomposed stride-2 ConvTranspose2d (k=4, s=2, p=1)
# ----------------------------------------------------------------------------
def conv_transpose_s2_parity(x, w, scale, shift, act, out_dtype):
    """x:(Cin,B,H,W)  w:(Cin,Cout,4,4)  ->  (Cout,B,2H,2W).

    For output parity (py,px), only kernel taps kh in {3-py, 1-py} and
    kw in {3-px, 1-px} contribute (the other 12 of 16 taps hit zeros of the
    dilated input), so each parity class is a plain 2x2 conv.
    """
    Cin, B, H, W = x.shape
    Cout = w.shape[1]
    xp = jnp.pad(x, ((0, 0), (0, 0), (1, 1), (1, 1)))   # pad 1 each side

    pats, wps = [], []
    for py in (0, 1):
        for px in (0, 1):
            taps_x, taps_w = [], []
            for dr in (0, 1):
                for dc in (0, 1):
                    taps_x.append(
                        xp[:, :, py + dr:py + dr + H, px + dc:px + dc + W])
                    kh = 3 - py - 2 * dr
                    kw = 3 - px - 2 * dc
                    taps_w.append(w[:, :, kh, kw])       # (Cin, Cout)
            pats.append(jnp.stack(taps_x, axis=0))       # (4, Cin, B, H, W)
            wps.append(jnp.stack(taps_w, axis=0).reshape(4 * Cin, Cout))

    xmat = jnp.stack(pats, axis=0).reshape(4, 4 * Cin, B * H * W)
    xmat = xmat.astype(jnp.bfloat16)
    wmat = jnp.stack(wps, axis=0)                        # (4, 4Cin, Cout)
    wmat = jnp.transpose(wmat, (0, 2, 1)) * scale[None, :, None]  # fold BN scale
    wmat = wmat.astype(jnp.bfloat16)
    shift2 = shift.reshape(Cout, 1).astype(jnp.float32)

    y = parity_matmul(wmat, xmat, shift2, act, out_dtype)  # (4, Cout, B*H*W)

    # interleave parities: full[co, b, 2h+py, 2w+px] = y[py, px, co, b, h, w]
    y = y.reshape(2, 2, Cout, B, H, W)
    y = jnp.transpose(y, (2, 3, 4, 0, 5, 1))             # (Cout,B,H,py,W,px)
    return y.reshape(Cout, B, 2 * H, 2 * W)


def fold_bn(gamma, beta, mean, var, eps=1e-5):
    scale = gamma * jax.lax.rsqrt(var + eps)
    shift = beta - mean * scale
    return scale, shift


# ----------------------------------------------------------------------------
# Generator forward
# ----------------------------------------------------------------------------
def generator_forward(params, latent, label):
    # embedding + mul + layer1 (ConvT 1x1 -> 4x4, ReLU), fused in one kernel
    x = embed_layer1(label, params["w_emb"], params["b_emb"], latent,
                     params["w1"])                       # (8nf, B, 4, 4) bf16
    # layer2..4: ConvT x2 + BN + ReLU  (internal layout (C, B, H, W), bf16)
    for i in (2, 3, 4):
        sc, sh = fold_bn(params[f"bn{i}_g"], params[f"bn{i}_b"],
                         params[f"bn{i}_m"], params[f"bn{i}_v"])
        x = conv_transpose_s2_parity(x, params[f"w{i}"], sc, sh,
                                     act="relu", out_dtype=jnp.bfloat16)
    # layer5: ConvT x2 + Tanh  (no BN), f32 output
    x = conv_transpose_s2_parity(x, params["w5"],
                                 jnp.ones((3,), jnp.float32),
                                 jnp.zeros((3,), jnp.float32),
                                 act="tanh", out_dtype=jnp.float32)
    # single layout change at the end: (C, B, H, W) -> NCHW
    return jnp.transpose(x, (1, 0, 2, 3))


# ----------------------------------------------------------------------------
# Deterministic parameter construction
# ----------------------------------------------------------------------------
def make_params(key, latent_size, nb_filter, n_classes):
    ks = jax.random.split(key, 16)
    nrm = lambda k, s, sd: (sd * jax.random.normal(k, s)).astype(jnp.float32)
    p = {
        "w_emb": nrm(ks[0], (latent_size, n_classes), 0.1),
        "b_emb": nrm(ks[1], (latent_size,), 0.1),
        "w1": nrm(ks[2], (latent_size, nb_filter * 8, 4, 4), 0.05),
        "w2": nrm(ks[3], (nb_filter * 8, nb_filter * 4, 4, 4), 0.05),
        "w3": nrm(ks[4], (nb_filter * 4, nb_filter * 2, 4, 4), 0.05),
        "w4": nrm(ks[5], (nb_filter * 2, nb_filter, 4, 4), 0.05),
        "w5": nrm(ks[6], (nb_filter, 3, 4, 4), 0.05),
    }
    for i, c, kk in ((2, nb_filter * 4, 7), (3, nb_filter * 2, 9),
                     (4, nb_filter, 11)):
        p[f"bn{i}_g"] = 1.0 + nrm(ks[kk], (c,), 0.05)
        p[f"bn{i}_b"] = nrm(ks[kk + 1], (c,), 0.05)
        p[f"bn{i}_m"] = nrm(ks[kk], (c,), 0.1) * 0.5
        p[f"bn{i}_v"] = 1.0 + 0.1 * jnp.abs(nrm(ks[kk + 1], (c,), 1.0))
    return p


if __name__ == "__main__":
    latent_size = 32   # small stand-in for 100
    nb_filter = 8
    n_classes = 10
    batch = 2

    key = jax.random.PRNGKey(0)
    k_par, k_lat = jax.random.split(key)
    params = make_params(k_par, latent_size, nb_filter, n_classes)

    latent = jax.random.normal(k_lat, (batch, latent_size), jnp.float32)
    label = jax.nn.one_hot(jnp.array([3, 7]), n_classes, dtype=jnp.float32)

    out = jax.jit(generator_forward)(params, latent, label)
    out = jax.block_until_ready(out)

    # spatial size is fixed by the architecture: 1 -> 4 -> 8 -> 16 -> 32 -> 64
    assert out.shape == (batch, 3, 64, 64), out.shape
    assert out.dtype == jnp.float32
    assert bool(jnp.all(jnp.isfinite(out)))
    assert bool(jnp.all(jnp.abs(out) <= 1.0 + 1e-6))  # tanh range
    print("KERNEL_OK")
</pallas_src>

<mosaic_0001>
module attributes {stable_mosaic.version = 11 : i64} {
  func.func @_embed_layer1_kernel(%arg0: memref<2x10xf32, #tpu.memory_space<vmem>>, %arg1: memref<10x32xf32, #tpu.memory_space<vmem>>, %arg2: memref<1x32xf32, #tpu.memory_space<vmem>>, %arg3: memref<2x32xf32, #tpu.memory_space<vmem>>, %arg4: memref<32x1024xf32, #tpu.memory_space<vmem>>, %arg5: memref<2x1024xbf16, #tpu.memory_space<vmem>>) attributes {dimension_semantics = [], scalar_prefetch = 0 : i64, scratch_operands = 0 : i64, tpu.core_type = #tpu.core_type<tc>} {
    %c0 = arith.constant 0 : index
    %c0_0 = arith.constant 0 : index
    %0 = vector.load %arg0[%c0, %c0_0] : memref<2x10xf32, #tpu.memory_space<vmem>>, vector<2x10xf32>
    %c0_1 = arith.constant 0 : index
    %c0_2 = arith.constant 0 : index
    %1 = vector.load %arg1[%c0_1, %c0_2] : memref<10x32xf32, #tpu.memory_space<vmem>>, vector<10x32xf32>
    %cst = arith.constant dense<0.000000e+00> : vector<2x32xf32>
    %2 = tpu.matmul %0, %1, %cst {dimension_numbers = #tpu.dot_dimension_numbers<[1], [0], [0], [1], [0, 0, 1, 1], [], []>} : vector<2x10xf32>, vector<10x32xf32>, vector<2x32xf32> -> vector<2x32xf32>
    %c0_3 = arith.constant 0 : index
    %c0_4 = arith.constant 0 : index
    %3 = vector.load %arg2[%c0_3, %c0_4] : memref<1x32xf32, #tpu.memory_space<vmem>>, vector<1x32xf32>
    %4 = vector.broadcast %3 : vector<1x32xf32> to vector<2x32xf32>
    %5 = arith.addf %2, %4 : vector<2x32xf32>
    %c0_5 = arith.constant 0 : index
    %c0_6 = arith.constant 0 : index
    %6 = vector.load %arg3[%c0_5, %c0_6] : memref<2x32xf32, #tpu.memory_space<vmem>>, vector<2x32xf32>
    %7 = arith.mulf %5, %6 : vector<2x32xf32>
    %c0_7 = arith.constant 0 : index
    %c0_8 = arith.constant 0 : index
    %8 = vector.load %arg4[%c0_7, %c0_8] : memref<32x1024xf32, #tpu.memory_space<vmem>>, vector<32x1024xf32>
    %cst_9 = arith.constant dense<0.000000e+00> : vector<2x1024xf32>
    %9 = tpu.matmul %7, %8, %cst_9 {dimension_numbers = #tpu.dot_dimension_numbers<[1], [0], [0], [1], [0, 0, 1, 1], [], []>} : vector<2x32xf32>, vector<32x1024xf32>, vector<2x1024xf32> -> vector<2x1024xf32>
    %cst_10 = arith.constant 0.000000e+00 : f32
    %10 = vector.broadcast %cst_10 : f32 to vector<2x1024xf32>
    %11 = arith.maximumf %9, %10 : vector<2x1024xf32>
    %12 = arith.truncf %11 : vector<2x1024xf32> to vector<2x1024xbf16>
    %c0_11 = arith.constant 0 : index
    %c0_12 = arith.constant 0 : index
    %13 = vector.load %arg5[%c0_11, %c0_12] : memref<2x1024xbf16, #tpu.memory_space<vmem>>, vector<2x1024xbf16>
    tpu.vector_store %arg5[%c0_11, %c0_12], %12 {strides = array<i32>} : memref<2x1024xbf16, #tpu.memory_space<vmem>>, vector<2x1024xbf16>,
    return
  }
}

module attributes {stable_mosaic.version = 11 : i64} {
  func.func @_parity_matmul_kernel(%arg0: i32, %arg1: i32, %arg2: memref<1x32x256xbf16, #tpu.memory_space<vmem>>, %arg3: memref<1x256x32xbf16, #tpu.memory_space<vmem>>, %arg4: memref<32x1xf32, #tpu.memory_space<vmem>>, %arg5: memref<1x32x32xbf16, #tpu.memory_space<vmem>>) attributes {dimension_semantics = [#tpu.dimension_semantics<parallel>, #tpu.dimension_semantics<parallel>], iteration_bounds = array<i64: 4, 1>, scalar_prefetch = 0 : i64, scratch_operands = 0 : i64, tpu.core_type = #tpu.core_type<tc>, window_params = [{transform_indices = @transform_0, window_bounds = array<i64: 1, 32, 256>}, {transform_indices = @transform_1, window_bounds = array<i64: 1, 256, 32>}, {pipeline_mode = #tpu.pipeline_mode<synchronous>, transform_indices = @transform_2, window_bounds = array<i64: 32, 1>}, {transform_indices = @transform_3, window_bounds = array<i64: 1, 32, 32>}]} {
    %c0 = arith.constant 0 : index
    %c0_0 = arith.constant 0 : index
    %c0_1 = arith.constant 0 : index
    %0 = vector.load %arg2[%c0, %c0_0, %c0_1] : memref<1x32x256xbf16, #tpu.memory_space<vmem>>, vector<1x32x256xbf16>
    %1 = vector.shape_cast %0 : vector<1x32x256xbf16> to vector<32x256xbf16>
    %c0_2 = arith.constant 0 : index
    %c0_3 = arith.constant 0 : index
    %c0_4 = arith.constant 0 : index
    %2 = vector.load %arg3[%c0_2, %c0_3, %c0_4] : memref<1x256x32xbf16, #tpu.memory_space<vmem>>, vector<1x256x32xbf16>
    %3 = vector.shape_cast %2 : vector<1x256x32xbf16> to vector<256x32xbf16>
    %cst = arith.constant dense<0.000000e+00> : vector<32x32xf32>
    %4 = tpu.matmul %1, %3, %cst {dimension_numbers = #tpu.dot_dimension_numbers<[1], [0], [0], [1], [0, 0, 1, 1], [], []>} : vector<32x256xbf16>, vector<256x32xbf16>, vector<32x32xf32> -> vector<32x32xf32>
    %c0_5 = arith.constant 0 : index
    %c0_6 = arith.constant 0 : index
    %5 = vector.load %arg4[%c0_5, %c0_6] : memref<32x1xf32, #tpu.memory_space<vmem>>, vector<32x1xf32>
    %6 = vector.broadcast %5 : vector<32x1xf32> to vector<32x32xf32>
    %7 = arith.addf %4, %6 : vector<32x32xf32>
    %cst_7 = arith.constant 0.000000e+00 : f32
    %8 = vector.broadcast %cst_7 : f32 to vector<32x32xf32>
    %9 = arith.maximumf %7, %8 : vector<32x32xf32>
    %10 = arith.truncf %9 : vector<32x32xf32> to vector<32x32xbf16>
    %c0_8 = arith.constant 0 : index
    %c0_9 = arith.constant 0 : index
    %c0_10 = arith.constant 0 : index
    %11 = vector.load %arg5[%c0_8, %c0_9, %c0_10] : memref<1x32x32xbf16, #tpu.memory_space<vmem>>, vector<1x32x32xbf16>
    %12 = vector.shape_cast %11 : vector<1x32x32xbf16> to vector<32x32xbf16>
    %13 = vector.shape_cast %10 : vector<32x32xbf16> to vector<1x32x32xbf16>
    tpu.vector_store %arg5[%c0_8, %c0_9, %c0_10], %13 {strides = array<i32>} : memref<1x32x32xbf16, #tpu.memory_space<vmem>>, vector<1x32x32xbf16>,
    return
  }
  func.func @transform_0(%arg0: i32, %arg1: i32) -> (i32, i32, i32) {
    %c0_i32 = arith.constant 0 : i32
    %c0_i32_0 = arith.constant 0 : i32
    %c0_i32_1 = arith.constant 0 : i32
    return %arg0, %c0_i32, %c0_i32_0 : i32, i32, i32
  }
  func.func @transform_1(%arg0: i32, %arg1: i32) -> (i32, i32, i32) {
    %c0_i32 = arith.constant 0 : i32
    %c0_i32_0 = arith.constant 0 : i32
    return %arg0, %c0_i32, %arg1 : i32, i32, i32
  }
  func.func @transform_2(%arg0: i32, %arg1: i32) -> (i32, i32) {
    %c0_i32 = arith.constant 0 : i32
    %c0_i32_0 = arith.constant 0 : i32
    %c0_i32_1 = arith.constant 0 : i32
    return %c0_i32, %c0_i32_0 : i32, i32
  }
  func.func @transform_3(%arg0: i32, %arg1: i32) -> (i32, i32, i32) {
    %c0_i32 = arith.constant 0 : i32
    %c0_i32_0 = arith.constant 0 : i32
    return %arg0, %c0_i32, %arg1 : i32, i32, i32
  }
}

module attributes {stable_mosaic.version = 11 : i64} {
  func.func @_parity_matmul_kernel(%arg0: i32, %arg1: i32, %arg2: memref<1x16x128xbf16, #tpu.memory_space<vmem>>, %arg3: memref<1x128x128xbf16, #tpu.memory_space<vmem>>, %arg4: memref<16x1xf32, #tpu.memory_space<vmem>>, %arg5: memref<1x16x128xbf16, #tpu.memory_space<vmem>>) attributes {dimension_semantics = [#tpu.dimension_semantics<parallel>, #tpu.dimension_semantics<parallel>], iteration_bounds = array<i64: 4, 1>, scalar_prefetch = 0 : i64, scratch_operands = 0 : i64, tpu.core_type = #tpu.core_type<tc>, window_params = [{transform_indices = @transform_0, window_bounds = array<i64: 1, 16, 128>}, {transform_indices = @transform_1, window_bounds = array<i64: 1, 128, 128>}, {pipeline_mode = #tpu.pipeline_mode<synchronous>, transform_indices = @transform_2, window_bounds = array<i64: 16, 1>}, {transform_indices = @transform_3, window_bounds = array<i64: 1, 16, 128>}]} {
    %c0 = arith.constant 0 : index
    %c0_0 = arith.constant 0 : index
    %c0_1 = arith.constant 0 : index
    %0 = vector.load %arg2[%c0, %c0_0, %c0_1] : memref<1x16x128xbf16, #tpu.memory_space<vmem>>, vector<1x16x128xbf16>
    %1 = vector.shape_cast %0 : vector<1x16x128xbf16> to vector<16x128xbf16>
    %c0_2 = arith.constant 0 : index
    %c0_3 = arith.constant 0 : index
    %c0_4 = arith.constant 0 : index
    %2 = vector.load %arg3[%c0_2, %c0_3, %c0_4] : memref<1x128x128xbf16, #tpu.memory_space<vmem>>, vector<1x128x128xbf16>
    %3 = vector.shape_cast %2 : vector<1x128x128xbf16> to vector<128x128xbf16>
    %cst = arith.constant dense<0.000000e+00> : vector<16x128xf32>
    %4 = tpu.matmul %1, %3, %cst {dimension_numbers = #tpu.dot_dimension_numbers<[1], [0], [0], [1], [0, 0, 1, 1], [], []>} : vector<16x128xbf16>, vector<128x128xbf16>, vector<16x128xf32> -> vector<16x128xf32>
    %c0_5 = arith.constant 0 : index
    %c0_6 = arith.constant 0 : index
    %5 = vector.load %arg4[%c0_5, %c0_6] : memref<16x1xf32, #tpu.memory_space<vmem>>, vector<16x1xf32>
    %6 = vector.broadcast %5 : vector<16x1xf32> to vector<16x128xf32>
    %7 = arith.addf %4, %6 : vector<16x128xf32>
    %cst_7 = arith.constant 0.000000e+00 : f32
    %8 = vector.broadcast %cst_7 : f32 to vector<16x128xf32>
    %9 = arith.maximumf %7, %8 : vector<16x128xf32>
    %10 = arith.truncf %9 : vector<16x128xf32> to vector<16x128xbf16>
    %c0_8 = arith.constant 0 : index
    %c0_9 = arith.constant 0 : index
    %c0_10 = arith.constant 0 : index
    %11 = vector.load %arg5[%c0_8, %c0_9, %c0_10] : memref<1x16x128xbf16, #tpu.memory_space<vmem>>, vector<1x16x128xbf16>
    %12 = vector.shape_cast %11 : vector<1x16x128xbf16> to vector<16x128xbf16>
    %13 = vector.shape_cast %10 : vector<16x128xbf16> to vector<1x16x128xbf16>
    tpu.vector_store %arg5[%c0_8, %c0_9, %c0_10], %13 {strides = array<i32>} : memref<1x16x128xbf16, #tpu.memory_space<vmem>>, vector<1x16x128xbf16>,
    return
  }
  func.func @transform_0(%arg0: i32, %arg1: i32) -> (i32, i32, i32) {
    %c0_i32 = arith.constant 0 : i32
    %c0_i32_0 = arith.constant 0 : i32
    %c0_i32_1 = arith.constant 0 : i32
    return %arg0, %c0_i32, %c0_i32_0 : i32, i32, i32
  }
  func.func @transform_1(%arg0: i32, %arg1: i32) -> (i32, i32, i32) {
    %c0_i32 = arith.constant 0 : i32
    %c0_i32_0 = arith.constant 0 : i32
    return %arg0, %c0_i32, %arg1 : i32, i32, i32
  }
  func.func @transform_2(%arg0: i32, %arg1: i32) -> (i32, i32) {
    %c0_i32 = arith.constant 0 : i32
    %c0_i32_0 = arith.constant 0 : i32
    %c0_i32_1 = arith.constant 0 : i32
    return %c0_i32, %c0_i32_0 : i32, i32
  }
  func.func @transform_3(%arg0: i32, %arg1: i32) -> (i32, i32, i32) {
    %c0_i32 = arith.constant 0 : i32
    %c0_i32_0 = arith.constant 0 : i32
    return %arg0, %c0_i32, %arg1 : i32, i32, i32
  }
}

module attributes {stable_mosaic.version = 11 : i64} {
  func.func @_parity_matmul_kernel(%arg0: i32, %arg1: i32, %arg2: memref<1x8x64xbf16, #tpu.memory_space<vmem>>, %arg3: memref<1x64x512xbf16, #tpu.memory_space<vmem>>, %arg4: memref<8x1xf32, #tpu.memory_space<vmem>>, %arg5: memref<1x8x512xbf16, #tpu.memory_space<vmem>>) attributes {dimension_semantics = [#tpu.dimension_semantics<parallel>, #tpu.dimension_semantics<parallel>], iteration_bounds = array<i64: 4, 1>, scalar_prefetch = 0 : i64, scratch_operands = 0 : i64, tpu.core_type = #tpu.core_type<tc>, window_params = [{transform_indices = @transform_0, window_bounds = array<i64: 1, 8, 64>}, {transform_indices = @transform_1, window_bounds = array<i64: 1, 64, 512>}, {pipeline_mode = #tpu.pipeline_mode<synchronous>, transform_indices = @transform_2, window_bounds = array<i64: 8, 1>}, {transform_indices = @transform_3, window_bounds = array<i64: 1, 8, 512>}]} {
    %c0 = arith.constant 0 : index
    %c0_0 = arith.constant 0 : index
    %c0_1 = arith.constant 0 : index
    %0 = vector.load %arg2[%c0, %c0_0, %c0_1] : memref<1x8x64xbf16, #tpu.memory_space<vmem>>, vector<1x8x64xbf16>
    %1 = vector.shape_cast %0 : vector<1x8x64xbf16> to vector<8x64xbf16>
    %c0_2 = arith.constant 0 : index
    %c0_3 = arith.constant 0 : index
    %c0_4 = arith.constant 0 : index
    %2 = vector.load %arg3[%c0_2, %c0_3, %c0_4] : memref<1x64x512xbf16, #tpu.memory_space<vmem>>, vector<1x64x512xbf16>
    %3 = vector.shape_cast %2 : vector<1x64x512xbf16> to vector<64x512xbf16>
    %cst = arith.constant dense<0.000000e+00> : vector<8x512xf32>
    %4 = tpu.matmul %1, %3, %cst {dimension_numbers = #tpu.dot_dimension_numbers<[1], [0], [0], [1], [0, 0, 1, 1], [], []>} : vector<8x64xbf16>, vector<64x512xbf16>, vector<8x512xf32> -> vector<8x512xf32>
    %c0_5 = arith.constant 0 : index
    %c0_6 = arith.constant 0 : index
    %5 = vector.load %arg4[%c0_5, %c0_6] : memref<8x1xf32, #tpu.memory_space<vmem>>, vector<8x1xf32>
    %6 = vector.broadcast %5 : vector<8x1xf32> to vector<8x512xf32>
    %7 = arith.addf %4, %6 : vector<8x512xf32>
    %cst_7 = arith.constant 0.000000e+00 : f32
    %8 = vector.broadcast %cst_7 : f32 to vector<8x512xf32>
    %9 = arith.maximumf %7, %8 : vector<8x512xf32>
    %10 = arith.truncf %9 : vector<8x512xf32> to vector<8x512xbf16>
    %c0_8 = arith.constant 0 : index
    %c0_9 = arith.constant 0 : index
    %c0_10 = arith.constant 0 : index
    %11 = vector.load %arg5[%c0_8, %c0_9, %c0_10] : memref<1x8x512xbf16, #tpu.memory_space<vmem>>, vector<1x8x512xbf16>
    %12 = vector.shape_cast %11 : vector<1x8x512xbf16> to vector<8x512xbf16>
    %13 = vector.shape_cast %10 : vector<8x512xbf16> to vector<1x8x512xbf16>
    tpu.vector_store %arg5[%c0_8, %c0_9, %c0_10], %13 {strides = array<i32>} : memref<1x8x512xbf16, #tpu.memory_space<vmem>>, vector<1x8x512xbf16>,
    return
  }
  func.func @transform_0(%arg0: i32, %arg1: i32) -> (i32, i32, i32) {
    %c0_i32 = arith.constant 0 : i32
    %c0_i32_0 = arith.constant 0 : i32
    %c0_i32_1 = arith.constant 0 : i32
    return %arg0, %c0_i32, %c0_i32_0 : i32, i32, i32
  }
  func.func @transform_1(%arg0: i32, %arg1: i32) -> (i32, i32, i32) {
    %c0_i32 = arith.constant 0 : i32
    %c0_i32_0 = arith.constant 0 : i32
    return %arg0, %c0_i32, %arg1 : i32, i32, i32
  }
  func.func @transform_2(%arg0: i32, %arg1: i32) -> (i32, i32) {
    %c0_i32 = arith.constant 0 : i32
    %c0_i32_0 = arith.constant 0 : i32
    %c0_i32_1 = arith.constant 0 : i32
    return %c0_i32, %c0_i32_0 : i32, i32
  }
  func.func @transform_3(%arg0: i32, %arg1: i32) -> (i32, i32, i32) {
    %c0_i32 = arith.constant 0 : i32
    %c0_i32_0 = arith.constant 0 : i32
    return %arg0, %c0_i32, %arg1 : i32, i32, i32
  }
}

module attributes {stable_mosaic.version = 11 : i64} {
  func.func @_parity_matmul_kernel(%arg0: i32, %arg1: i32, %arg2: memref<1x3x32xbf16, #tpu.memory_space<vmem>>, %arg3: memref<1x32x2048xbf16, #tpu.memory_space<vmem>>, %arg4: memref<3x1xf32, #tpu.memory_space<vmem>>, %arg5: memref<1x3x2048xf32, #tpu.memory_space<vmem>>) attributes {dimension_semantics = [#tpu.dimension_semantics<parallel>, #tpu.dimension_semantics<parallel>], iteration_bounds = array<i64: 4, 1>, scalar_prefetch = 0 : i64, scratch_operands = 0 : i64, tpu.core_type = #tpu.core_type<tc>, window_params = [{transform_indices = @transform_0, window_bounds = array<i64: 1, 3, 32>}, {transform_indices = @transform_1, window_bounds = array<i64: 1, 32, 2048>}, {pipeline_mode = #tpu.pipeline_mode<synchronous>, transform_indices = @transform_2, window_bounds = array<i64: 3, 1>}, {transform_indices = @transform_3, window_bounds = array<i64: 1, 3, 2048>}]} {
    %c0 = arith.constant 0 : index
    %c0_0 = arith.constant 0 : index
    %c0_1 = arith.constant 0 : index
    %0 = vector.load %arg2[%c0, %c0_0, %c0_1] : memref<1x3x32xbf16, #tpu.memory_space<vmem>>, vector<1x3x32xbf16>
    %1 = vector.shape_cast %0 : vector<1x3x32xbf16> to vector<3x32xbf16>
    %c0_2 = arith.constant 0 : index
    %c0_3 = arith.constant 0 : index
    %c0_4 = arith.constant 0 : index
    %2 = vector.load %arg3[%c0_2, %c0_3, %c0_4] : memref<1x32x2048xbf16, #tpu.memory_space<vmem>>, vector<1x32x2048xbf16>
    %3 = vector.shape_cast %2 : vector<1x32x2048xbf16> to vector<32x2048xbf16>
    %cst = arith.constant dense<0.000000e+00> : vector<3x2048xf32>
    %4 = tpu.matmul %1, %3, %cst {dimension_numbers = #tpu.dot_dimension_numbers<[1], [0], [0], [1], [0, 0, 1, 1], [], []>} : vector<3x32xbf16>, vector<32x2048xbf16>, vector<3x2048xf32> -> vector<3x2048xf32>
    %c0_5 = arith.constant 0 : index
    %c0_6 = arith.constant 0 : index
    %5 = vector.load %arg4[%c0_5, %c0_6] : memref<3x1xf32, #tpu.memory_space<vmem>>, vector<3x1xf32>
    %6 = vector.broadcast %5 : vector<3x1xf32> to vector<3x2048xf32>
    %7 = arith.addf %4, %6 : vector<3x2048xf32>
    %8 = math.tanh %7 : vector<3x2048xf32>
    %c0_7 = arith.constant 0 : index
    %c0_8 = arith.constant 0 : index
    %c0_9 = arith.constant 0 : index
    %9 = vector.load %arg5[%c0_7, %c0_8, %c0_9] : memref<1x3x2048xf32, #tpu.memory_space<vmem>>, vector<1x3x2048xf32>
    %10 = vector.shape_cast %9 : vector<1x3x2048xf32> to vector<3x2048xf32>
    %11 = vector.shape_cast %8 : vector<3x2048xf32> to vector<1x3x2048xf32>
    tpu.vector_store %arg5[%c0_7, %c0_8, %c0_9], %11 {strides = array<i32>} : memref<1x3x2048xf32, #tpu.memory_space<vmem>>, vector<1x3x2048xf32>,
    return
  }
  func.func @transform_0(%arg0: i32, %arg1: i32) -> (i32, i32, i32) {
    %c0_i32 = arith.constant 0 : i32
    %c0_i32_0 = arith.constant 0 : i32
    %c0_i32_1 = arith.constant 0 : i32
    return %arg0, %c0_i32, %c0_i32_0 : i32, i32, i32
  }
  func.func @transform_1(%arg0: i32, %arg1: i32) -> (i32, i32, i32) {
    %c0_i32 = arith.constant 0 : i32
    %c0_i32_0 = arith.constant 0 : i32
    return %arg0, %c0_i32, %arg1 : i32, i32, i32
  }
  func.func @transform_2(%arg0: i32, %arg1: i32) -> (i32, i32) {
    %c0_i32 = arith.constant 0 : i32
    %c0_i32_0 = arith.constant 0 : i32
    %c0_i32_1 = arith.constant 0 : i32
    return %c0_i32, %c0_i32_0 : i32, i32
  }
  func.func @transform_3(%arg0: i32, %arg1: i32) -> (i32, i32, i32) {
    %c0_i32 = arith.constant 0 : i32
    %c0_i32_0 = arith.constant 0 : i32
    return %arg0, %c0_i32, %arg1 : i32, i32, i32
  }
}

</mosaic_0001>

<bundles_post_ra>
// kernel: generator_forward.5
= control target key start
LH: loop header
LB: loop body
LE: loop exit
PB: predicated region body
PF: predicated region fallthrough
CT: control target
= control target key end

     0   :  { %10 = vsyncpa [#allocation3], 0  ;;  %s838_s0 = inlined_call_operand.hbm [shape: f32[2,10], index: 0, kind: input, shape index: {}]   ;;  %s839_s1 = inlined_call_operand.hbm [shape: f32[10,32], index: 1, kind: input, shape index: {}]   ;;  %s840_s2 = inlined_call_operand.hbm [shape: f32[1,32], index: 2, kind: input, shape index: {}]   ;;  %s841_s3 = inlined_call_operand.hbm [shape: f32[2,32], index: 3, kind: input, shape index: {}]   ;;  %s842_s4 = inlined_call_operand.vmem [shape: f32[32,1024], index: 4, kind: input, shape index: {}]   ;;  %s843_s5 = inlined_call_operand.vmem [shape: bf16[2,1024], index: 5, kind: output, shape index: {}]  }
   0x1   :  { %11 = vsyncpa [#allocation5], 0 }
   0x2   :  { %12 = vsyncpa [#allocation8], 0  ;;  %s677_s18 = smov [#allocation4]  }
   0x3   :  { %s28_s19 = sshll.u32 %s677_s18, 4  ;;  %s29_s19 = int_to_ptr.vmem [resolvable:$true] %s28_s19 }
   0x4   :  { %s599_s20 = scalar_lea.vmem %s29_s19, 256  ;;  %p604_p1 = scmp.lt.s32.totalorder %s29_s19, %s29_s19 }
   0x5   :  { %p600_p0 = scmp.ne.s32.totalorder %s29_s19, %s599_s20  ;;  %p605_p2 = scmp.lt.s32.totalorder %s599_s20, %s599_s20 }
   0x7   :  { %p606_p3 = por %p605_p2, %p604_p1 }
   0x9   :  { %p607_p4 = pnand %p606_p3, %p600_p0 }
   0xb   :  { %610 = shalt.err (!%p607_p4)
}
   0xc   :  { %s678_s21 = smov 128   ;;  %s679_s22 = smov 8  }
   0xd   :  { %34 = dma.hbm_to_vmem [thread:$0]  %s839_s1, 256, %s29_s19, [#allocation5], %s678_s21, %s678_s21, %s679_s22  }
   0xe   :  { %s680_s25 = smov [#allocation2]   ;;  %s681_s27 = smov [#allocation6]  }
   0xf   :  { %s19_s26 = sshll.u32 %s680_s25, 4  ;;  %s41_s28 = sshll.u32 %s681_s27, 4  ;;  %s20_s26 = int_to_ptr.vmem [resolvable:$true] %s19_s26  ;;  %s42_s28 = int_to_ptr.vmem [resolvable:$true] %s41_s28 }
  0x10   :  { %s619_s29 = scalar_lea.vmem %s20_s26, 32  ;;  %p624_p6 = scmp.lt.s32.totalorder %s20_s26, %s20_s26 }
  0x11   :  { %p620_p5 = scmp.ne.s32.totalorder %s20_s26, %s619_s29  ;;  %p625_p7 = scmp.lt.s32.totalorder %s619_s29, %s619_s29 }
  0x13   :  { %p626_p8 = por %p625_p7, %p624_p6 }
  0x15   :  { %p627_p9 = pnand %p626_p8, %p620_p5 }
  0x17   :  { %630 = shalt.err (!%p627_p9)
}
  0x18   :  { %22 = dma.hbm_to_vmem [thread:$0]  %s838_s0, 32, %s20_s26, [#allocation3]  }
  0x19   :  { %s639_s7 = scalar_lea.vmem %s42_s28, 16  ;;  %s643_s1 = scalar_lea.vmem %s42_s28, 32 }
  0x1a   :  { %p640_p10 = scmp.ne.s32.totalorder %s42_s28, %s639_s7  ;;  %p644_p11 = scmp.lt.s32.totalorder %s42_s28, %s42_s28 }
  0x1b   :  { %p645_p12 = scmp.lt.s32.totalorder %s643_s1, %s639_s7 }
  0x1d   :  { %p646_p13 = por %p645_p12, %p644_p11 }
  0x1f   :  { %p647_p0 = pnand %p646_p13, %p640_p10 }
  0x21   :  { %650 = shalt.err (!%p647_p0)
}
  0x22   :  { %44 = dma.hbm_to_vmem [thread:$0]  %s840_s2, 16, %s42_s28, [#allocation5]  }
  0x23   :  { %s682_s10 = smov [#allocation7]  }
  0x24   :  { %s51_s11 = sshll.u32 %s682_s10, 4  ;;  %s52_s11 = int_to_ptr.vmem [resolvable:$true] %s51_s11 }
  0x25   :  { %s659_s12 = scalar_lea.vmem %s52_s11, 32  ;;  %p664_p2 = scmp.lt.s32.totalorder %s52_s11, %s52_s11 }
  0x26   :  { %p660_p1 = scmp.ne.s32.totalorder %s52_s11, %s659_s12  ;;  %p665_p3 = scmp.lt.s32.totalorder %s659_s12, %s659_s12 }
  0x28   :  { %p666_p4 = por %p665_p3, %p664_p2 }
  0x2a   :  { %p667_p5 = pnand %p666_p4, %p660_p1 }
  0x2c   :  { %670 = shalt.err (!%p667_p5)
}
  0x2d   :  { %54 = dma.hbm_to_vmem [thread:$0]  %s841_s3, 32, %s52_s11, [#allocation8]  }
  0x2e   :  { %671 = dma.done.wait [#allocation3], 32  }
  0x2f   :  { %672 = vsyncadd [#allocation3], 4294967264 }
  0x30   :  { %673 = dma.done.wait [#allocation5], 272  }
  0x31   :  { %674 = vsyncadd [#allocation5], 4294967024 }
  0x32   :  { %675 = dma.done.wait [#allocation8], 32  }
  0x33   :  { %676 = vsyncadd [#allocation8], 4294967264  ;;  %v683_v0 = vmov 0.0   ;;  %vm684_vm0 = vmmov 0   ;;  %vm83_vm1 = vcmask 1041408   ;;  %v70_v2 = vld [vmem:[#allocation4] sm:$0xff]  ;;  %v510_v44 = vlaneseq }
  0x34   :  { %575 = vmatprep.subr.mxu0 %v683_v0  ;;  %579 = vmatprep.mubr.msk.f32.mxu0 %vm684_vm0, %v683_v0  ;;  %v71_v1 = vld [vmem:[#allocation4 + $0x8] sm:$0x3]  ;;  %v69_v3 = vld [vmem:[#allocation2] sm:$0x3]  ;;  %vm79_vm2 = vcmask 80896   ;;  %v186_v5 = vld [vmem:[%s842_s4 + $0xd8] sm:$0xff] }
  0x35   :  { %259 = vmatprep.mubr.f32.mxu1 %v683_v0  ;;  %576 = vmatpush3.msk.msra.mxu0 %vm83_vm1, %v71_v1  ;;  %v184_v4 = vld [vmem:[%s842_s4 + $0xc8] sm:$0xff]  ;;  %v183_v6 = vld [vmem:[%s842_s4 + $0xc0] sm:$0xff]  ;;  %v185_v7 = vld [vmem:[%s842_s4 + $0xd0] sm:$0xff]  ;;  %vm191_vm3 = vcmask 261120   ;;  %v685_v42 = vmov 1966171168  }
  0x36   :  { %577 = vmatprep.subr.mxu0 %v683_v0  ;;  %219 = vmatprep.subr.mxu1 %v184_v4  ;;  %v176_v8 = vld [vmem:[%s842_s4 + $0x88] sm:$0xff]  ;;  %v178_v9 = vld [vmem:[%s842_s4 + $0x98] sm:$0xff]  ;;  %v175_v10 = vld [vmem:[%s842_s4 + $0x80] sm:$0xff]  ;;  %v508_v43 = vunpack.c.l.s4 %v685_v42  ;;  %v511_v51 = vshrl.u32 %v510_v44, 7 }
  0x37   :  { %578 = vmatpush3.msra.mxu0 %v70_v2  ;;  %220 = vmatpush1.msra.mxu1 %v183_v6  ;;  %v177_v11 = vld [vmem:[%s842_s4 + $0x90] sm:$0xff]  ;;  %v168_v12 = vld [vmem:[%s842_s4 + $0x48] sm:$0xff]  ;;  %v170_v13 = vld [vmem:[%s842_s4 + $0x58] sm:$0xff] }
  0x38   :  { %580 = vmatmul.mubr.msk.f32.vlgmr.msra.gmra.mxu0 %vm79_vm2, %v69_v3  ;;  %290 = vmatprep.subr.mxu0 %v186_v5  ;;  %v167_v14 = vld [vmem:[%s842_s4 + $0x40] sm:$0xff]  ;;  %v169_v15 = vld [vmem:[%s842_s4 + $0x50] sm:$0xff]  ;;  %v160_v16 = vld [vmem:[%s842_s4 + $0x8] sm:$0xff]  ;;  %v509_v50 = vunpack.c.0.s8 %v508_v43 }
  0x39   :  { %291 = vmatpush1.msra.mxu0 %v185_v7  ;;  %221 = vmatprep.subr.mxu1 %v176_v8  ;;  %v162_v17 = vld [vmem:[%s842_s4 + $0x18] sm:$0xff]  ;;  %v159_v18 = vld [vmem:[%s842_s4] sm:$0xff]  ;;  %v161_v19 = vld [vmem:[%s842_s4 + $0x10] sm:$0xff] }
  0x3a   :  { %292 = vmatprep.subr.mxu0 %v178_v9  ;;  %222 = vmatpush1.msra.mxu1 %v175_v10  ;;  %v188_v20 = vld [vmem:[%s842_s4 + $0xe8] sm:$0xff]  ;;  %v190_v21 = vld [vmem:[%s842_s4 + $0xf8] sm:$0xff]  ;;  %v561_v22 = vld [vmem:[#allocation6] ss:$0 sm:$0xff]  ;;  %v512_v56 = vsub.s32 %v509_v50, %v511_v51 }
  0x3b   :  { %293 = vmatpush1.msra.mxu0 %v177_v11  ;;  %330 = vmatprep.mubr.f32.mxu0 %v683_v0  ;;  %v157_v24 = vld [vmem:[#allocation7] sm:$0x3]  ;;  %v187_v28 = vld [vmem:[%s842_s4 + $0xe0] sm:$0xff]  ;;  %v180_v30 = vld [vmem:[%s842_s4 + $0xa8] sm:$0xff] }
  0x3c   :  { %223 = vmatprep.subr.mxu1 %v168_v12  ;;  %294 = vmatprep.subr.mxu0 %v170_v13  ;;  %v189_v29 = vld [vmem:[%s842_s4 + $0xf0] sm:$0xff]  ;;  %v182_v31 = vld [vmem:[%s842_s4 + $0xb8] sm:$0xff]  ;;  %v179_v32 = vld [vmem:[%s842_s4 + $0xa0] sm:$0xff] }
  0x3d   :  { %224 = vmatpush1.msra.mxu1 %v167_v14  ;;  %295 = vmatpush1.msra.mxu0 %v169_v15  ;;  %v181_v33 = vld [vmem:[%s842_s4 + $0xb0] sm:$0xff]  ;;  %v172_v34 = vld [vmem:[%s842_s4 + $0x68] sm:$0xff]  ;;  %v174_v35 = vld [vmem:[%s842_s4 + $0x78] sm:$0xff] }
  0x3e   :  { %225 = vmatprep.subr.mxu1 %v160_v16  ;;  %296 = vmatprep.subr.mxu0 %v162_v17  ;;  %v171_v36 = vld [vmem:[%s842_s4 + $0x60] sm:$0xff]  ;;  %v173_v37 = vld [vmem:[%s842_s4 + $0x70] sm:$0xff]  ;;  %v164_v38 = vld [vmem:[%s842_s4 + $0x28] sm:$0xff] }
  0x3f   :  { %226 = vmatpush1.msra.mxu1 %v159_v18  ;;  %297 = vmatpush1.msra.mxu0 %v161_v19  ;;  %v166_v39 = vld [vmem:[%s842_s4 + $0x38] sm:$0xff]  ;;  %v163_v40 = vld [vmem:[%s842_s4 + $0x20] sm:$0xff]  ;;  %v165_v41 = vld [vmem:[%s842_s4 + $0x30] sm:$0xff] }
  0x40   :  { %361 = vmatprep.subr.mxu1 %v188_v20  ;;  %432 = vmatprep.subr.mxu0 %v190_v21 }
  0xf8   :  { %v153_v23 = vpop.f32.mrf.mxu0 }
  0xf9   :  { %v154_v25 = vadd.f32 %v561_v22, %v153_v23 }
  0xfa   :  { %v581_v26 = vpop.f32.mrf.mxu0 }
  0xfb   :  { %v158_v27 = vmul.f32 %v157_v24, %v154_v25 }
  0xfd   :  { %564 = vmatmul.mubr.msk.f32.vlgmr.msra.gmra.mxu1 %vm191_vm3, %v158_v27  ;;  %565 = vmatmul.mubr.msk.f32.vlgmr.msra.gmra.mxu0 %vm191_vm3, %v158_v27 }
  0xfe   :  { %362 = vmatpush1.msra.mxu1 %v187_v28  ;;  %433 = vmatpush1.msra.mxu0 %v189_v29 }
  0xff   :  { %363 = vmatprep.subr.mxu1 %v180_v30  ;;  %434 = vmatprep.subr.mxu0 %v182_v31 }
 0x100   :  { %364 = vmatpush1.msra.mxu1 %v179_v32  ;;  %435 = vmatpush1.msra.mxu0 %v181_v33 }
 0x101   :  { %365 = vmatprep.subr.mxu1 %v172_v34  ;;  %436 = vmatprep.subr.mxu0 %v174_v35 }
 0x102   :  { %366 = vmatpush1.msra.mxu1 %v171_v36  ;;  %437 = vmatpush1.msra.mxu0 %v173_v37 }
 0x103   :  { %367 = vmatprep.subr.mxu1 %v164_v38  ;;  %438 = vmatprep.subr.mxu0 %v166_v39 }
 0x104   :  { %368 = vmatpush1.msra.mxu1 %v163_v40  ;;  %401 = vmatprep.mubr.f32.mxu1 %v683_v0 }
 0x105   :  { %439 = vmatpush1.msra.mxu0 %v165_v41  ;;  %472 = vmatprep.mubr.f32.mxu0 %v683_v0 }
 0x106   :  { %566 = vmatmul.mubr.msk.f32.vlgmr.msra.gmra.mxu1 %vm191_vm3, %v158_v27  ;;  %567 = vmatmul.mubr.msk.f32.vlgmr.msra.gmra.mxu0 %vm191_vm3, %v158_v27 }
 0x1bd   :  { %v261_v45 = vpop.f32.mrf.mxu1  ;;  %v332_v46 = vpop.f32.mrf.mxu0 }
 0x1be   :  { %v479_v53 = vmax.f32 %v261_v45, 0.0  ;;  %v481_v54 = vmax.f32 %v332_v46, 0.0 }
 0x1bf   :  { %v263_v47 = vpop.f32.mrf.mxu1  ;;  %v334_v48 = vpop.f32.mrf.mxu0 }
 0x1c0   :  { %v480_v49 = vmax.f32 %v263_v47, 0.0  ;;  %v482_v52 = vmax.f32 %v334_v48, 0.0 }
 0x1c2   :  { %v568_v55 = vpack.c.bf16 %v480_v49, %v479_v53  ;;  %v569_v57 = vpack.c.bf16 %v482_v52, %v481_v54 }
 0x1c4   :  { %v513_v60 = vrot.slane %v568_v55, %v512_v56  ;;  %v520_v61 = vrot.slane %v569_v57, %v512_v56 }
 0x1c6   :  { %v403_v58 = vpop.f32.mrf.mxu1  ;;  %v474_v59 = vpop.f32.mrf.mxu0  ;;  %v535_v6 = vcombine.low %v513_v60, %v520_v61 }
 0x1c7   :  { %v483_v0 = vmax.f32 %v403_v58, 0.0  ;;  %v485_v1 = vmax.f32 %v474_v59, 0.0 }
 0x1c8   :  { %v405_v62 = vpop.f32.mrf.mxu1  ;;  %v476_v63 = vpop.f32.mrf.mxu0  ;;  %v543_v10 = vrot.slane %v535_v6, %v512_v56 }
 0x1c9   :  { %v484_v2 = vmax.f32 %v405_v62, 0.0  ;;  %v486_v3 = vmax.f32 %v476_v63, 0.0 }
 0x1cb   :  { %v570_v4 = vpack.c.bf16 %v484_v2, %v483_v0  ;;  %v571_v5 = vpack.c.bf16 %v486_v3, %v485_v1 }
 0x1cd   :  { %v527_v7 = vrot.slane %v570_v4, %v512_v56  ;;  %v534_v8 = vrot.slane %v571_v5, %v512_v56 }
 0x1cf   :  { %v536_v9 = vcombine.low %v527_v7, %v534_v8 }
 0x1d1   :  { %v550_v11 = vrot.slane %v536_v9, %v512_v56 }
 0x1d3   :  { %v551_v12 = vcombine.low %v543_v10, %v550_v11 }
 0x1d5   :  { %553 = vst [vmem:[%s843_s5] sm:$0xff] %v551_v12 }
 0x1d6   :  { %558 = vsyncpa [#allocation3], 1 }
 0x1d7   :  { %559 = vsyncpa [#allocation5], 1 }
 0x1d8   :  { %560 = vsyncpa [#allocation8], 1 }

// kernel: generator_forward.6
= control target key start
LH: loop header
LB: loop body
LE: loop exit
PB: predicated region body
PF: predicated region fallthrough
CT: control target
= control target key end

     0   :  { %s750_s12 = smov 0   ;;  %s752_s13 = smov 0   ;;  %s821_s0 = inlined_call_operand.vmem [shape: bf16[4,32,256], index: 0, kind: input, shape index: {}]   ;;  %s822_s1 = inlined_call_operand.vmem [shape: bf16[4,256,32], index: 1, kind: input, shape index: {}]   ;;  %s823_s2 = inlined_call_operand.vmem [shape: f32[32,1], index: 2, kind: input, shape index: {}]   ;;  %s824_s3 = inlined_call_operand.vmem [shape: bf16[4,32,32], index: 3, kind: output, shape index: {}]  }
   0x1   :  { %s754_s14 = smov 0  }
   0x2 LB: > { %s25_s15 = sadd.s32 1, %s723_s13  ;;  %p572_p0 = scmp.ge.s32.totalorder %s727_s14, 1  ;;  %s727_s14 = sphi %s754_s14, %s13_s14   ;;  %s723_s13 = sphi %s752_s13, %s826_s13   ;;  %s719_s12 = sphi %s750_s12, %s825_s12  }
   0x3   : > { %p27_p1 = scmp.ge.s32.totalorder %s25_s15, 4  ;;  %p166_p2 = scmp.lt.s32.totalorder %s727_s14, 5 }
   0x5   : > { %s828_s15 = smov (%p27_p1, %s25_s15), 0  ;;  %p167_p3 = pnand %p572_p0, %p166_p2 }
   0x6   : > { %p201_p4 = scmp.lt.s32.totalorder (!%p167_p3), %s719_s12, 3 }
   0x7   : > { %170 = sbr.rel (%p167_p3) target bundleno = 256 (0x100), region = 32 }
   0xc   : > { %v261_v0 = vld [vmem:[%s823_s2 + $0x10] sm:$0xff]  ;;  %v259_v1 = vld [vmem:[%s823_s2] sm:$0xff]  ;;  %v729_v2 = vmov 0   ;;  %s830_s12 = smov (!%p201_p4, %s719_s12), 3  ;;  %v262_v3 = vld [vmem:[%s823_s2 + $0x18] sm:$0xff]  ;;  %vm468_vm0 = vcmask 257024  }
   0xd   : > { %682 = vset.pattern.permute.xlu1 %v729_v2  ;;  %681 = vset.pattern.permute.xlu0 %v729_v2  ;;  %v260_v4 = vld [vmem:[%s823_s2 + $0x8] sm:$0xff]  ;;  %s606_s24 = sshll.u32 %s830_s12, 7  ;;  %s605_s28 = sshll.u32 %s830_s12, 5 }
   0xe   : > { %275 = vperm.xlu1 %682, %v261_v0   ;;  %265 = vperm.xlu0 %681, %v259_v1   ;;  %s786_s27 = scalar_lea.vmem %s822_s1, %s606_s24  ;;  %s205_s4 = scalar_lea.vmem %s821_s0, %s605_s28 }
   0xf   : > { %v683_v5 = vld [vmem:[%s786_s27 + $0x78] sm:$0xff]   ;;  %v685_v7 = vld [vmem:[%s786_s27 + $0x70] sm:$0xff]   ;;  %v687_v9 = vld [vmem:[%s786_s27 + $0x68] sm:$0xff]   ;;  %s607_s5 = sshll.u32 %s830_s12, 4 }
  0x10   : > { %v684_v6 = vld [vmem:[%s786_s27 + $0x38] sm:$0xff]   ;;  %612 = vmatprep.subr.bf16.mxu0 %v683_v5  ;;  %640 = vmatprep.subr.bf16.mxu1 %v683_v5  ;;  %v686_v8 = vld [vmem:[%s786_s27 + $0x30] sm:$0xff]   ;;  %v688_v10 = vld [vmem:[%s786_s27 + $0x28] sm:$0xff]   ;;  %s221_s8 = scalar_lea.vmem %s824_s3, %s607_s5 }
  0x11   : > { %613 = vmatpush3.bf16.msra.mxu0 %v684_v6  ;;  %648 = vmatpush3.bf16.msra.mxu1 %v684_v6  ;;  %v689_v11 = vld [vmem:[%s786_s27 + $0x60] sm:$0xff]   ;;  %v691_v13 = vld [vmem:[%s786_s27 + $0x58] sm:$0xff]   ;;  %v693_v15 = vld [vmem:[%s786_s27 + $0x50] sm:$0xff]  }
  0x12   : > { %280 = vperm.xlu1 %682, %v262_v3   ;;  %270 = vperm.xlu0 %681, %v260_v4   ;;  %v690_v12 = vld [vmem:[%s786_s27 + $0x20] sm:$0xff]   ;;  %v692_v14 = vld [vmem:[%s786_s27 + $0x18] sm:$0xff]   ;;  %v694_v18 = vld [vmem:[%s786_s27 + $0x10] sm:$0xff]  }
  0x13   : > { %614 = vmatprep.subr.bf16.mxu0 %v685_v7  ;;  %641 = vmatprep.subr.bf16.mxu1 %v685_v7  ;;  %v701_v16 = vld [vmem:[%s205_s4 + $0x4] ss:$8 sps:$4 sm:$0xff]   ;;  %v704_v17 = vld [vmem:[%s205_s4 + $0x14] ss:$8 sps:$4 sm:$0xff]   ;;  %v699_v23 = vld [vmem:[%s205_s4] ss:$8 sps:$4 sm:$0xff]  }
  0x14   : > { %v695_v19 = vld [vmem:[%s786_s27 + $0x48] sm:$0xff]   ;;  %431 = vmatprep.mubr.bf16.mxu0 %v701_v16  ;;  %439 = vmatprep.mubr.bf16.mxu1 %v704_v17  ;;  %v697_v21 = vld [vmem:[%s786_s27 + $0x40] sm:$0xff]   ;;  %v702_v24 = vld [vmem:[%s205_s4 + $0x10] ss:$8 sps:$4 sm:$0xff]  }
  0x15   : > { %615 = vmatpush3.bf16.msra.mxu0 %v686_v8  ;;  %649 = vmatpush3.bf16.msra.mxu1 %v686_v8  ;;  %v696_v20 = vld [vmem:[%s786_s27 + $0x8] sm:$0xff]   ;;  %v698_v22 = vld [vmem:[%s786_s27] sm:$0xff]  }
  0x16   : > { %616 = vmatprep.subr.bf16.mxu0 %v687_v9  ;;  %642 = vmatprep.subr.bf16.mxu1 %v687_v9 }
  0x19   : > { %617 = vmatpush3.bf16.msra.mxu0 %v688_v10  ;;  %650 = vmatpush3.bf16.msra.mxu1 %v688_v10 }
  0x1a   : > { %618 = vmatprep.subr.bf16.mxu0 %v689_v11  ;;  %643 = vmatprep.subr.bf16.mxu1 %v689_v11 }
  0x1d   : > { %619 = vmatpush3.bf16.msra.mxu0 %v690_v12  ;;  %651 = vmatpush3.bf16.msra.mxu1 %v690_v12 }
  0x1e   : > { %620 = vmatprep.subr.bf16.mxu0 %v691_v13  ;;  %644 = vmatprep.subr.bf16.mxu1 %v691_v13 }
  0x21   : > { %621 = vmatpush3.bf16.msra.mxu0 %v692_v14  ;;  %652 = vmatpush3.bf16.msra.mxu1 %v692_v14 }
  0x22   : > { %622 = vmatprep.subr.bf16.mxu0 %v693_v15  ;;  %645 = vmatprep.subr.bf16.mxu1 %v693_v15 }
  0x25   : > { %623 = vmatpush3.bf16.msra.mxu0 %v694_v18  ;;  %653 = vmatpush3.bf16.msra.mxu1 %v694_v18 }
  0x26   : > { %624 = vmatprep.subr.bf16.mxu0 %v695_v19  ;;  %646 = vmatprep.subr.bf16.mxu1 %v695_v19 }
  0x29   : > { %625 = vmatpush3.bf16.msra.mxu0 %v696_v20  ;;  %654 = vmatpush3.bf16.msra.mxu1 %v696_v20 }
  0x2a   : > { %626 = vmatprep.subr.bf16.mxu0 %v697_v21  ;;  %647 = vmatprep.subr.bf16.mxu1 %v697_v21 }
  0x2d   : > { %627 = vmatpush3.bf16.msra.mxu0 %v698_v22  ;;  %655 = vmatpush3.bf16.msra.mxu1 %v698_v22 }
  0x30   : > { %432 = vmatmul.mubr.bf16.vlgmr.msra.gmra.mxu0 %v699_v23  ;;  %440 = vmatmul.mubr.bf16.vlgmr.msra.gmra.mxu1 %v702_v24 }
  0x89   : > { %v276_v27 = vpop.permute.xlu1 %275  ;;  %v266_v28 = vpop.permute.xlu0 %265 }
  0x8d   : > { %v281_v43 = vpop.permute.xlu1 %280  ;;  %v271_v44 = vpop.permute.xlu0 %270 }
  0xf0   : > { %v628_v25 = vpop.f32.mrf.mxu0  ;;  %v634_v26 = vpop.f32.mrf.mxu1 }
  0xf2   : > { %v629_v29 = vpop.f32.mrf.mxu0  ;;  %v635_v30 = vpop.f32.mrf.mxu1 }
  0xf3   : > { %v630_v31 = vadd.f32 %v629_v29, %v628_v25  ;;  %v636_v32 = vadd.f32 %v635_v30, %v634_v26 }
  0xf4   : > { %v631_v33 = vpop.f32.mrf.mxu0  ;;  %v637_v34 = vpop.f32.mrf.mxu1 }
  0xf5   : > { %v434_v35 = vadd.f32 %v630_v31, %v266_v28  ;;  %v442_v36 = vadd.f32 %v636_v32, %v276_v27 }
  0xf6   : > { %v632_v37 = vpop.f32.mrf.mxu0  ;;  %v638_v38 = vpop.f32.mrf.mxu1 }
  0xf7   : > { %v448_v39 = vmax.f32 %v434_v35, 0.0  ;;  %v450_v40 = vmax.f32 %v442_v36, 0.0  ;;  %v633_v41 = vadd.f32 %v632_v37, %v631_v33  ;;  %v639_v42 = vadd.f32 %v638_v38, %v637_v34 }
  0xf9   : > { %v608_v45 = vpack.c.bf16 %v448_v39, %v448_v39  ;;  %v610_v46 = vpack.c.bf16 %v450_v40, %v450_v40  ;;  %v437_v47 = vadd.f32 %v633_v41, %v271_v44  ;;  %v445_v48 = vadd.f32 %v639_v42, %v281_v43 }
  0xfb   : > { %469 = vst.msk [vmem:[%s221_s8] sm:$0xf] %vm468_vm0, %v608_v45  ;;  %471 = vst.msk [vmem:[%s221_s8 + $0x8] sm:$0xf] %vm468_vm0, %v610_v46  ;;  %v449_v49 = vmax.f32 %v437_v47, 0.0  ;;  %v451_v50 = vmax.f32 %v445_v48, 0.0 }
  0xfd   : > { %v609_v51 = vpack.c.bf16 %v449_v49, %v449_v49  ;;  %v611_v52 = vpack.c.bf16 %v451_v50, %v451_v50 }
  0xff   : > { %470 = vst.msk [vmem:[%s221_s8 + $0x4] sm:$0xf] %vm468_vm0, %v609_v51  ;;  %472 = vst.msk [vmem:[%s221_s8 + $0xc] sm:$0xf] %vm468_vm0, %v611_v52 }
 0x100 PF: > { %s13_s14 = sadd.s32 1, %s727_s14   ;;  %s825_s12 = smov %s723_s13 }
 0x101   : > { %p10_p5 = scmp.ge.s32.totalorder %s13_s14, 6   ;;  %s826_s13 = smov %s828_s15 }
 0x103   :  { %12 = sbr.rel (!%p10_p5) target bundleno = 2 (0x2), region = 65 }

// kernel: generator_forward.7
= control target key start
LH: loop header
LB: loop body
LE: loop exit
PB: predicated region body
PF: predicated region fallthrough
CT: control target
= control target key end

     0   :  { %s602_s12 = smov 0   ;;  %s604_s13 = smov 0   ;;  %s652_s0 = inlined_call_operand.vmem [shape: bf16[4,16,128], index: 0, kind: input, shape index: {}]   ;;  %s653_s1 = inlined_call_operand.vmem [shape: bf16[4,128,128], index: 1, kind: input, shape index: {}]   ;;  %s654_s2 = inlined_call_operand.vmem [shape: f32[16,1], index: 2, kind: input, shape index: {}]   ;;  %s655_s3 = inlined_call_operand.vmem [shape: bf16[4,16,128], index: 3, kind: output, shape index: {}]  }
   0x1   :  { %s606_s14 = smov 0  }
   0x2 LB: > { %s25_s15 = sadd.s32 1, %s573_s13  ;;  %p459_p0 = scmp.ge.s32.totalorder %s577_s14, 1  ;;  %s577_s14 = sphi %s606_s14, %s13_s14   ;;  %s573_s13 = sphi %s604_s13, %s657_s13   ;;  %s569_s12 = sphi %s602_s12, %s656_s12  }
   0x3   : > { %p27_p1 = scmp.ge.s32.totalorder %s25_s15, 4  ;;  %p166_p2 = scmp.lt.s32.totalorder %s577_s14, 5 }
   0x5   : > { %s659_s15 = smov (%p27_p1, %s25_s15), 0  ;;  %p167_p3 = pnand %p459_p0, %p166_p2 }
   0x6   : > { %p201_p4 = scmp.lt.s32.totalorder (!%p167_p3), %s569_s12, 3 }
   0x7   : > { %170 = sbr.rel (%p167_p3) target bundleno = 251 (0xfb), region = 32 }
   0xc   : > { %v241_v0 = vld [vmem:[%s654_s2] sm:$0xff]  ;;  %v579_v1 = vmov 0.0   ;;  %vm580_vm0 = vmmov 0   ;;  %s661_s12 = smov (!%p201_p4, %s569_s12), 3  ;;  %v581_v2 = vmov 0   ;;  %v242_v3 = vld [vmem:[%s654_s2 + $0x8] sm:$0xff] }
   0xd   : > { %498 = vmatprep.subr.bf16.mxu0 %v579_v1  ;;  %514 = vmatprep.mubr.msk.bf16.mxu0 %vm580_vm0, %v579_v1  ;;  %s480_s18 = sshll.u32 %s661_s12, 6  ;;  %s479_s24 = sshll.u32 %s661_s12, 3 }
   0xe   : > { %545 = vset.pattern.permute.xlu0 %v581_v2  ;;  %s213_s23 = scalar_lea.vmem %s653_s1, %s480_s18  ;;  %s205_s27 = scalar_lea.vmem %s652_s0, %s479_s24 }
   0xf   : > { %245 = vperm.xlu0 %545, %v241_v0   ;;  %v546_v4 = vld [vmem:[%s213_s23 + $0x38] sm:$0xff]   ;;  %v547_v5 = vld [vmem:[%s213_s23 + $0x30] sm:$0xff]   ;;  %v548_v6 = vld [vmem:[%s213_s23 + $0x28] sm:$0xff]   ;;  %s221_s30 = scalar_lea.vmem %s655_s3, %s479_s24 }
  0x10   : > { %499 = vmatpush3.bf16.msra.mxu0 %v546_v4  ;;  %v549_v7 = vld [vmem:[%s213_s23 + $0x20] sm:$0xff]   ;;  %v550_v8 = vld [vmem:[%s213_s23 + $0x18] sm:$0xff]   ;;  %v551_v9 = vld [vmem:[%s213_s23 + $0x10] sm:$0xff]  }
  0x11   : > { %500 = vmatprep.subr.bf16.mxu0 %v579_v1  ;;  %v552_v10 = vld [vmem:[%s213_s23 + $0x8] sm:$0xff]   ;;  %v553_v11 = vld [vmem:[%s213_s23] sm:$0xff]  }
  0x12   : > { %v554_v12 = vld [vmem:[%s205_s27] sm:$0xff]  }
  0x13   : > { %250 = vperm.xlu0 %545, %v242_v3  }
  0x14   : > { %501 = vmatpush3.bf16.msra.mxu0 %v547_v5 }
  0x15   : > { %502 = vmatprep.subr.bf16.mxu0 %v579_v1 }
  0x18   : > { %503 = vmatpush3.bf16.msra.mxu0 %v548_v6 }
  0x19   : > { %504 = vmatprep.subr.bf16.mxu0 %v579_v1 }
  0x1c   : > { %505 = vmatpush3.bf16.msra.mxu0 %v549_v7 }
  0x1d   : > { %506 = vmatprep.subr.bf16.mxu0 %v579_v1 }
  0x20   : > { %507 = vmatpush3.bf16.msra.mxu0 %v550_v8 }
  0x21   : > { %508 = vmatprep.subr.bf16.mxu0 %v579_v1 }
  0x24   : > { %509 = vmatpush3.bf16.msra.mxu0 %v551_v9 }
  0x25   : > { %510 = vmatprep.subr.bf16.mxu0 %v579_v1 }
  0x28   : > { %511 = vmatpush3.bf16.msra.mxu0 %v552_v10 }
  0x29   : > { %512 = vmatprep.subr.bf16.mxu0 %v579_v1 }
  0x2c   : > { %513 = vmatpush3.bf16.msra.mxu0 %v553_v11 }
  0x2f   : > { %515 = vmatmul.mubr.bf16.vlgmr.msra.gmra.mxu0 %v554_v12 }
  0x8a   : > { %v246_v13 = vpop.permute.xlu0 %245 }
  0x8e   : > { %v251_v17 = vpop.permute.xlu0 %250 }
  0xef   : > { %v341_v14 = vpop.f32.mrf.mxu0 }
  0xf0   : > { %v342_v16 = vadd.f32 %v341_v14, %v246_v13 }
  0xf1   : > { %v516_v15 = vpop.f32.mrf.mxu0 }
  0xf2   : > { %v348_v21 = vmax.f32 %v342_v16, 0.0 }
  0xf3   : > { %v344_v18 = vpop.f32.mrf.mxu0 }
  0xf4   : > { %v345_v19 = vadd.f32 %v344_v18, %v251_v17 }
  0xf5   : > { %v517_v20 = vpop.f32.mrf.mxu0 }
  0xf6   : > { %v349_v22 = vmax.f32 %v345_v19, 0.0 }
  0xf8   : > { %v487_v23 = vpack.c.bf16 %v349_v22, %v348_v21 }
  0xfa   : > { %488 = vst [vmem:[%s221_s30] sm:$0xff] %v487_v23  }
  0xfb PF: > { %s13_s14 = sadd.s32 1, %s577_s14   ;;  %s656_s12 = smov %s573_s13 }
  0xfc   : > { %p10_p5 = scmp.ge.s32.totalorder %s13_s14, 6   ;;  %s657_s13 = smov %s659_s15 }
  0xfe   :  { %12 = sbr.rel (!%p10_p5) target bundleno = 2 (0x2), region = 65 }

// kernel: generator_forward.8
= control target key start
LH: loop header
LB: loop body
LE: loop exit
PB: predicated region body
PF: predicated region fallthrough
CT: control target
= control target key end

     0   :  { %s669_s12 = smov 0   ;;  %s671_s13 = smov 0   ;;  %s713_s0 = inlined_call_operand.vmem [shape: bf16[4,8,64], index: 0, kind: input, shape index: {}]   ;;  %s714_s1 = inlined_call_operand.vmem [shape: bf16[4,64,512], index: 1, kind: input, shape index: {}]   ;;  %s715_s2 = inlined_call_operand.vmem [shape: f32[8,1], index: 2, kind: input, shape index: {}]   ;;  %s716_s3 = inlined_call_operand.vmem [shape: bf16[4,8,512], index: 3, kind: output, shape index: {}]  }
   0x1   :  { %s673_s14 = smov 0  }
   0x2 LB: > { %s25_s15 = sadd.s32 1, %s642_s13  ;;  %p542_p0 = scmp.ge.s32.totalorder %s646_s14, 1  ;;  %s646_s14 = sphi %s673_s14, %s13_s14   ;;  %s642_s13 = sphi %s671_s13, %s718_s13   ;;  %s638_s12 = sphi %s669_s12, %s717_s12  }
   0x3   : > { %p27_p1 = scmp.ge.s32.totalorder %s25_s15, 4  ;;  %p167_p2 = scmp.lt.s32.totalorder %s646_s14, 5 }
   0x5   : > { %s720_s15 = smov (%p27_p1, %s25_s15), 0  ;;  %p168_p3 = pnand %p542_p0, %p167_p2 }
   0x6   : > { %p203_p4 = scmp.lt.s32.totalorder (!%p168_p3), %s638_s12, 3 }
   0x7   : > { %171 = sbr.rel (%p168_p3) target bundleno = 234 (0xea), region = 32 }
   0xc   : > { %v245_v0 = vld [vmem:[%s715_s2] sm:$0xff]  ;;  %v648_v1 = vmov 0   ;;  %s722_s12 = smov (!%p203_p4, %s638_s12), 3  ;;  %vm331_vm0 = vcmask 523264  }
   0xd   : > { %367 = vmatprep.mubr.bf16.mxu0 %v648_v1  ;;  %408 = vmatprep.mubr.bf16.mxu1 %v648_v1  ;;  %s570_s18 = sshll.u32 %s722_s12, 7  ;;  %s543_s22 = sshll.u32 %s722_s12, 2 }
   0xe   : > { %599 = vset.pattern.permute.xlu0 %v648_v1  ;;  %s215_s21 = scalar_lea.vmem %s714_s1, %s570_s18  ;;  %s206_s25 = scalar_lea.vmem %s713_s0, %s543_s22 }
   0xf   : > { %248 = vperm.xlu0 %599, %v245_v0   ;;  %v600_v2 = vld [vmem:[%s215_s21 + $0x64] ss:$16 sps:$4 sm:$0xff]   ;;  %v602_v3 = vld [vmem:[%s215_s21 + $0x6c] ss:$16 sps:$4 sm:$0xff]   ;;  %v604_v4 = vld [vmem:[%s215_s21 + $0x60] ss:$16 sps:$4 sm:$0xff]  }
  0x10   : > { %343 = vmatprep.subr.bf16.mxu0 %v600_v2  ;;  %v605_v5 = vld [vmem:[%s215_s21 + $0x68] ss:$16 sps:$4 sm:$0xff]   ;;  %384 = vmatprep.subr.bf16.mxu1 %v602_v3  ;;  %v606_v6 = vld [vmem:[%s215_s21 + $0x44] ss:$16 sps:$4 sm:$0xff]   ;;  %v608_v7 = vld [vmem:[%s215_s21 + $0x4c] ss:$16 sps:$4 sm:$0xff]  }
  0x11   : > { %344 = vmatpush1.bf16.msra.mxu0 %v604_v4  ;;  %385 = vmatpush1.bf16.msra.mxu1 %v605_v5  ;;  %v610_v8 = vld [vmem:[%s215_s21 + $0x40] ss:$16 sps:$4 sm:$0xff]   ;;  %v611_v9 = vld [vmem:[%s215_s21 + $0x48] ss:$16 sps:$4 sm:$0xff]   ;;  %v612_v10 = vld [vmem:[%s215_s21 + $0x24] ss:$16 sps:$4 sm:$0xff]  }
  0x12   : > { %345 = vmatprep.subr.bf16.mxu0 %v606_v6  ;;  %386 = vmatprep.subr.bf16.mxu1 %v608_v7  ;;  %v614_v11 = vld [vmem:[%s215_s21 + $0x2c] ss:$16 sps:$4 sm:$0xff]   ;;  %v616_v12 = vld [vmem:[%s215_s21 + $0x20] ss:$16 sps:$4 sm:$0xff]   ;;  %v617_v13 = vld [vmem:[%s215_s21 + $0x28] ss:$16 sps:$4 sm:$0xff]  }
  0x13   : > { %v618_v14 = vld [vmem:[%s215_s21 + $0x4] ss:$16 sps:$4 sm:$0xff]   ;;  %v620_v15 = vld [vmem:[%s215_s21 + $0xc] ss:$16 sps:$4 sm:$0xff]   ;;  %v622_v16 = vld [vmem:[%s215_s21] ss:$16 sps:$4 sm:$0xff]  }
  0x14   : > { %v623_v17 = vld [vmem:[%s215_s21 + $0x8] ss:$16 sps:$4 sm:$0xff]   ;;  %v228_v18 = vld [vmem:[%s206_s25] sm:$0xf]  ;;  %s571_s26 = sshll.u32 %s722_s12, 4 }
  0x15   : > { %346 = vmatpush1.bf16.msra.mxu0 %v610_v8  ;;  %387 = vmatpush1.bf16.msra.mxu1 %v611_v9  ;;  %s225_s29 = scalar_lea.vmem %s716_s3, %s571_s26 }
  0x16   : > { %347 = vmatprep.subr.bf16.mxu0 %v612_v10  ;;  %388 = vmatprep.subr.bf16.mxu1 %v614_v11 }
  0x19   : > { %348 = vmatpush1.bf16.msra.mxu0 %v616_v12  ;;  %389 = vmatpush1.bf16.msra.mxu1 %v617_v13 }
  0x1a   : > { %349 = vmatprep.subr.bf16.mxu0 %v618_v14  ;;  %390 = vmatprep.subr.bf16.mxu1 %v620_v15 }
  0x1d   : > { %350 = vmatpush1.bf16.msra.mxu0 %v622_v16  ;;  %391 = vmatpush1.bf16.msra.mxu1 %v623_v17 }
  0x20   : > { %564 = vmatmul.mubr.msk.bf16.vlgmr.msra.gmra.mxu0 %vm331_vm0, %v228_v18  ;;  %565 = vmatmul.mubr.msk.bf16.vlgmr.msra.gmra.mxu1 %vm331_vm0, %v228_v18 }
  0x8a   : > { %v249_v19 = vpop.permute.xlu0 %248 }
  0xe0   : > { %v369_v20 = vpop.f32.mrf.mxu0  ;;  %v410_v21 = vpop.f32.mrf.mxu1 }
  0xe1   : > { %v370_v22 = vadd.f32 %v369_v20, %v249_v19  ;;  %v411_v23 = vadd.f32 %v410_v21, %v249_v19 }
  0xe2   : > { %v371_v24 = vpop.f32.mrf.mxu0  ;;  %v412_v25 = vpop.f32.mrf.mxu1 }
  0xe3   : > { %v372_v26 = vadd.f32 %v371_v24, %v249_v19  ;;  %v413_v27 = vadd.f32 %v412_v25, %v249_v19  ;;  %v417_v30 = vmax.f32 %v370_v22, 0.0  ;;  %v419_v31 = vmax.f32 %v411_v23, 0.0 }
  0xe4   : > { %v373_v28 = vpop.f32.mrf.mxu0  ;;  %v414_v29 = vpop.f32.mrf.mxu1 }
  0xe5   : > { %v418_v32 = vmax.f32 %v372_v26, 0.0  ;;  %v420_v33 = vmax.f32 %v413_v27, 0.0 }
  0xe6   : > { %v374_v34 = vpop.f32.mrf.mxu0  ;;  %v415_v35 = vpop.f32.mrf.mxu1 }
  0xe7   : > { %v572_v36 = vpack.c.bf16 %v418_v32, %v417_v30  ;;  %v573_v37 = vpack.c.bf16 %v420_v33, %v419_v31 }
  0xe9   : > { %437 = vst [vmem:[%s225_s29] sm:$0xff] %v572_v36  ;;  %438 = vst [vmem:[%s225_s29 + $0x8] sm:$0xff] %v573_v37 }
  0xea PF: > { %s13_s14 = sadd.s32 1, %s646_s14   ;;  %s717_s12 = smov %s642_s13 }
  0xeb   : > { %p10_p5 = scmp.ge.s32.totalorder %s13_s14, 6   ;;  %s718_s13 = smov %s720_s15 }
  0xed   :  { %12 = sbr.rel (!%p10_p5) target bundleno = 2 (0x2), region = 65 }

// kernel: generator_forward.9
= control target key start
LH: loop header
LB: loop body
LE: loop exit
PB: predicated region body
PF: predicated region fallthrough
CT: control target
= control target key end

     0   :  { %s1071_s12 = smov 0   ;;  %s1073_s13 = smov 0   ;;  %s1204_s0 = inlined_call_operand.vmem [shape: bf16[4,3,32], index: 0, kind: input, shape index: {}]   ;;  %s1205_s1 = inlined_call_operand.vmem [shape: bf16[4,32,2048], index: 1, kind: input, shape index: {}]   ;;  %s1206_s2 = inlined_call_operand.vmem [shape: f32[3,1], index: 2, kind: input, shape index: {}]   ;;  %s1207_s3 = inlined_call_operand.vmem [shape: f32[4,3,2048], index: 3, kind: output, shape index: {}]  }
   0x1   :  { %s1075_s14 = smov 0  }
   0x2 LB: > { %s25_s15 = sadd.s32 1, %s1044_s13  ;;  %p918_p0 = scmp.ge.s32.totalorder %s1048_s14, 1  ;;  %s1048_s14 = sphi %s1075_s14, %s13_s14   ;;  %s1044_s13 = sphi %s1073_s13, %s1209_s13   ;;  %s1040_s12 = sphi %s1071_s12, %s1208_s12  }
   0x3   : > { %p27_p1 = scmp.ge.s32.totalorder %s25_s15, 4  ;;  %p167_p2 = scmp.lt.s32.totalorder %s1048_s14, 5 }
   0x5   : > { %s1211_s15 = smov (%p27_p1, %s25_s15), 0  ;;  %p168_p3 = pnand %p918_p0, %p167_p2 }
   0x6   : > { %p203_p4 = scmp.lt.s32.totalorder (!%p168_p3), %s1040_s12, 3 }
   0x7   : > { %171 = sbr.rel (%p168_p3) target bundleno = 266 (0x10a), region = 32 }
   0xc   : > { %v261_v0 = vld [vmem:[%s1206_s2] sm:$0x7]  ;;  %v1050_v1 = vmov 0   ;;  %s1213_s12 = smov (!%p203_p4, %s1040_s12), 3  ;;  %vm427_vm0 = vcmask 261120  }
   0xd   : > { %463 = vmatprep.mubr.bf16.mxu0 %v1050_v1  ;;  %504 = vmatprep.mubr.bf16.mxu1 %v1050_v1  ;;  %s966_s18 = sshll.u32 %s1213_s12, 8  ;;  %s919_s22 = sshll.u32 %s1213_s12, 1 }
   0xe   : > { %993 = vset.pattern.permute.xlu0 %v1050_v1  ;;  %s1101_s21 = scalar_lea.vmem %s1205_s1, %s966_s18  ;;  %s206_s25 = scalar_lea.vmem %s1204_s0, %s919_s22 }
   0xf   : > { %264 = vperm.xlu0 %993, %v261_v0   ;;  %v245_v2 = vld [vmem:[%s1101_s21 + $0x80] sm:$0xff]  ;;  %v246_v4 = vld [vmem:[%s1101_s21 + $0x88] sm:$0xff]  ;;  %v247_v16 = vld [vmem:[%s1101_s21 + $0x90] sm:$0xff]  ;;  %s967_s26 = sshll.u32 %s1213_s12, 6 }
  0x10   : > { %v253_v3 = vld [vmem:[%s1101_s21 + $0xc0] sm:$0xff]  ;;  %v254_v6 = vld [vmem:[%s1101_s21 + $0xc8] sm:$0xff]  ;;  %v255_v17 = vld [vmem:[%s1101_s21 + $0xd0] sm:$0xff]  ;;  %s1178_s29 = scalar_lea.vmem %s1207_s3, %s967_s26 }
  0x11   : > { %v941_v5 = vcombine.high %v245_v2, %v253_v3  ;;  %v940_v7 = vcombine.low %v245_v2, %v253_v3  ;;  %v229_v8 = vld [vmem:[%s1101_s21] sm:$0xff]  ;;  %v943_v10 = vcombine.high %v246_v4, %v254_v6  ;;  %v942_v11 = vcombine.low %v246_v4, %v254_v6  ;;  %v230_v13 = vld [vmem:[%s1101_s21 + $0x8] sm:$0xff]  ;;  %v248_v18 = vld [vmem:[%s1101_s21 + $0x98] sm:$0xff] }
  0x12   : > { %v237_v9 = vld [vmem:[%s1101_s21 + $0x40] sm:$0xff]  ;;  %v238_v14 = vld [vmem:[%s1101_s21 + $0x48] sm:$0xff]  ;;  %v256_v20 = vld [vmem:[%s1101_s21 + $0xd8] sm:$0xff]  ;;  %v945_v22 = vcombine.high %v247_v16, %v255_v17  ;;  %v944_v29 = vcombine.low %v247_v16, %v255_v17 }
  0x13   : > { %v925_v12 = vcombine.high %v229_v8, %v237_v9  ;;  %443 = vmatprep.subr.bf16.mxu0 %v941_v5  ;;  %v927_v15 = vcombine.high %v230_v13, %v238_v14  ;;  %484 = vmatprep.subr.bf16.mxu1 %v943_v10  ;;  %v924_v19 = vcombine.low %v229_v8, %v237_v9  ;;  %v231_v24 = vld [vmem:[%s1101_s21 + $0x10] sm:$0xff]  ;;  %v232_v26 = vld [vmem:[%s1101_s21 + $0x18] sm:$0xff]  ;;  %v1123_v28 = vld [vmem:[%s206_s25] sm:$0x3] }
  0x14   : > { %444 = vmatpush1.bf16.msra.mxu0 %v940_v7  ;;  %485 = vmatpush1.bf16.msra.mxu1 %v942_v11  ;;  %v926_v21 = vcombine.low %v230_v13, %v238_v14  ;;  %v947_v23 = vcombine.high %v248_v18, %v256_v20  ;;  %v239_v25 = vld [vmem:[%s1101_s21 + $0x50] sm:$0xff]  ;;  %v240_v27 = vld [vmem:[%s1101_s21 + $0x58] sm:$0xff]  ;;  %v946_v30 = vcombine.low %v248_v18, %v256_v20  ;;  %v249_v33 = vld [vmem:[%s1101_s21 + $0xa0] sm:$0xff] }
  0x15   : > { %445 = vmatprep.subr.bf16.mxu0 %v925_v12  ;;  %486 = vmatprep.subr.bf16.mxu1 %v927_v15  ;;  %v929_v31 = vcombine.high %v231_v24, %v239_v25  ;;  %v931_v32 = vcombine.high %v232_v26, %v240_v27  ;;  %v257_v34 = vld [vmem:[%s1101_s21 + $0xe0] sm:$0xff]  ;;  %v250_v35 = vld [vmem:[%s1101_s21 + $0xa8] sm:$0xff]  ;;  %v928_v37 = vcombine.low %v231_v24, %v239_v25  ;;  %v251_v49 = vld [vmem:[%s1101_s21 + $0xb0] sm:$0xff] }
  0x16   : > { %v258_v36 = vld [vmem:[%s1101_s21 + $0xe8] sm:$0xff]  ;;  %v930_v38 = vcombine.low %v232_v26, %v240_v27  ;;  %v949_v39 = vcombine.high %v249_v33, %v257_v34  ;;  %v233_v41 = vld [vmem:[%s1101_s21 + $0x20] sm:$0xff]  ;;  %v948_v45 = vcombine.low %v249_v33, %v257_v34  ;;  %v259_v50 = vld [vmem:[%s1101_s21 + $0xf0] sm:$0xff] }
  0x17   : > { %v951_v40 = vcombine.high %v250_v35, %v258_v36  ;;  %v241_v42 = vld [vmem:[%s1101_s21 + $0x60] sm:$0xff]  ;;  %v234_v43 = vld [vmem:[%s1101_s21 + $0x28] sm:$0xff]  ;;  %v950_v46 = vcombine.low %v250_v35, %v258_v36  ;;  %v252_v51 = vld [vmem:[%s1101_s21 + $0xb8] sm:$0xff]  ;;  %v953_v55 = vcombine.high %v251_v49, %v259_v50  ;;  %v952_v61 = vcombine.low %v251_v49, %v259_v50 }
  0x18   : > { %446 = vmatpush1.bf16.msra.mxu0 %v924_v19  ;;  %487 = vmatpush1.bf16.msra.mxu1 %v926_v21  ;;  %v242_v44 = vld [vmem:[%s1101_s21 + $0x68] sm:$0xff]  ;;  %v933_v47 = vcombine.high %v233_v41, %v241_v42  ;;  %v260_v52 = vld [vmem:[%s1101_s21 + $0xf8] sm:$0xff]  ;;  %v932_v53 = vcombine.low %v233_v41, %v241_v42  ;;  %v235_v57 = vld [vmem:[%s1101_s21 + $0x30] sm:$0xff] }
  0x19   : > { %525 = vmatprep.subr.bf16.mxu0 %v945_v22  ;;  %566 = vmatprep.subr.bf16.mxu1 %v947_v23  ;;  %v935_v48 = vcombine.high %v234_v43, %v242_v44  ;;  %v934_v54 = vcombine.low %v234_v43, %v242_v44  ;;  %v955_v56 = vcombine.high %v252_v51, %v260_v52  ;;  %v243_v58 = vld [vmem:[%s1101_s21 + $0x70] sm:$0xff]  ;;  %v236_v59 = vld [vmem:[%s1101_s21 + $0x38] sm:$0xff] }
  0x1a   : > { %v244_v60 = vld [vmem:[%s1101_s21 + $0x78] sm:$0xff]  ;;  %v954_v62 = vcombine.low %v252_v51, %v260_v52  ;;  %v937_v63 = vcombine.high %v235_v57, %v243_v58  ;;  %v936_v2 = vcombine.low %v235_v57, %v243_v58 }
  0x1b   : > { %956 = vmatmul.mubr.msk.bf16.vlgmr.msra.gmra.mxu0 %vm427_vm0, %v1123_v28  ;;  %957 = vmatmul.mubr.msk.bf16.vlgmr.msra.gmra.mxu1 %vm427_vm0, %v1123_v28  ;;  %v939_v0 = vcombine.high %v236_v59, %v244_v60  ;;  %v938_v3 = vcombine.low %v236_v59, %v244_v60 }
  0x1c   : > { %526 = vmatpush1.bf16.msra.mxu0 %v944_v29  ;;  %567 = vmatpush1.bf16.msra.mxu1 %v946_v30 }
  0x1d   : > { %527 = vmatprep.subr.bf16.mxu0 %v929_v31  ;;  %568 = vmatprep.subr.bf16.mxu1 %v931_v32 }
  0x1e   : > { %545 = vmatprep.mubr.bf16.mxu0 %v1050_v1  ;;  %586 = vmatprep.mubr.bf16.mxu1 %v1050_v1 }
  0x20   : > { %528 = vmatpush1.bf16.msra.mxu0 %v928_v37  ;;  %569 = vmatpush1.bf16.msra.mxu1 %v930_v38 }
  0x21   : > { %607 = vmatprep.subr.bf16.mxu0 %v949_v39  ;;  %648 = vmatprep.subr.bf16.mxu1 %v951_v40 }
  0x23   : > { %958 = vmatmul.mubr.msk.bf16.vlgmr.msra.gmra.mxu0 %vm427_vm0, %v1123_v28  ;;  %959 = vmatmul.mubr.msk.bf16.vlgmr.msra.gmra.mxu1 %vm427_vm0, %v1123_v28 }
  0x24   : > { %608 = vmatpush1.bf16.msra.mxu0 %v948_v45  ;;  %649 = vmatpush1.bf16.msra.mxu1 %v950_v46 }
  0x25   : > { %609 = vmatprep.subr.bf16.mxu0 %v933_v47  ;;  %650 = vmatprep.subr.bf16.mxu1 %v935_v48 }
  0x26   : > { %627 = vmatprep.mubr.bf16.mxu0 %v1050_v1  ;;  %668 = vmatprep.mubr.bf16.mxu1 %v1050_v1 }
  0x28   : > { %610 = vmatpush1.bf16.msra.mxu0 %v932_v53  ;;  %651 = vmatpush1.bf16.msra.mxu1 %v934_v54 }
  0x29   : > { %689 = vmatprep.subr.bf16.mxu0 %v953_v55  ;;  %730 = vmatprep.subr.bf16.mxu1 %v955_v56 }
  0x2b   : > { %960 = vmatmul.mubr.msk.bf16.vlgmr.msra.gmra.mxu0 %vm427_vm0, %v1123_v28  ;;  %961 = vmatmul.mubr.msk.bf16.vlgmr.msra.gmra.mxu1 %vm427_vm0, %v1123_v28 }
  0x2c   : > { %690 = vmatpush1.bf16.msra.mxu0 %v952_v61  ;;  %731 = vmatpush1.bf16.msra.mxu1 %v954_v62 }
  0x2d   : > { %691 = vmatprep.subr.bf16.mxu0 %v937_v63  ;;  %732 = vmatprep.subr.bf16.mxu1 %v939_v0 }
  0x2e   : > { %709 = vmatprep.mubr.bf16.mxu0 %v1050_v1  ;;  %750 = vmatprep.mubr.bf16.mxu1 %v1050_v1 }
  0x30   : > { %692 = vmatpush1.bf16.msra.mxu0 %v936_v2  ;;  %733 = vmatpush1.bf16.msra.mxu1 %v938_v3 }
  0x33   : > { %962 = vmatmul.mubr.msk.bf16.vlgmr.msra.gmra.mxu0 %vm427_vm0, %v1123_v28  ;;  %963 = vmatmul.mubr.msk.bf16.vlgmr.msra.gmra.mxu1 %vm427_vm0, %v1123_v28 }
  0x8a   : > { %v1163_v4 = vpop.permute.xlu0 %264 }
  0xdb   : > { %v465_v5 = vpop.f32.mrf.mxu0  ;;  %v506_v6 = vpop.f32.mrf.mxu1 }
  0xdc   : > { %v466_v7 = vadd.f32 %v465_v5, %v1163_v4  ;;  %v507_v9 = vadd.f32 %v506_v6, %v1163_v4 }
  0xdd   : > { %v467_v8 = vpop.f32.mrf.mxu0  ;;  %v508_v1 = vpop.f32.mrf.mxu1 }
  0xde   : > { %v468_v10 = vadd.f32 %v467_v8, %v1163_v4  ;;  %994 = vtanh.f32 %v466_v7  ;;  %v509_v11 = vadd.f32 %v508_v1, %v1163_v4 }
  0xdf   : > { %996 = vtanh.f32 %v507_v9  ;;  %v469_v12 = vpop.f32.mrf.mxu0  ;;  %v510_v13 = vpop.f32.mrf.mxu1 }
  0xe0   : > { %998 = vtanh.f32 %v468_v10 }
  0xe1   : > { %1000 = vtanh.f32 %v509_v11  ;;  %v470_v14 = vpop.f32.mrf.mxu0  ;;  %v511_v15 = vpop.f32.mrf.mxu1 }
  0xe3   : > { %v547_v16 = vpop.f32.mrf.mxu0  ;;  %v588_v18 = vpop.f32.mrf.mxu1 }
  0xe4   : > { %v548_v17 = vadd.f32 %v547_v16, %v1163_v4  ;;  %v589_v19 = vadd.f32 %v588_v18, %v1163_v4 }
  0xe5   : > { %v549_v20 = vpop.f32.mrf.mxu0  ;;  %v590_v22 = vpop.f32.mrf.mxu1 }
  0xe6   : > { %1002 = vtanh.f32 %v548_v17  ;;  %v550_v21 = vadd.f32 %v549_v20, %v1163_v4  ;;  %v591_v23 = vadd.f32 %v590_v22, %v1163_v4 }
  0xe7   : > { %1004 = vtanh.f32 %v589_v19  ;;  %v551_v24 = vpop.f32.mrf.mxu0  ;;  %v592_v25 = vpop.f32.mrf.mxu1 }
  0xe8   : > { %1006 = vtanh.f32 %v550_v21 }
  0xe9   : > { %1008 = vtanh.f32 %v591_v23  ;;  %v552_v26 = vpop.f32.mrf.mxu0  ;;  %v593_v27 = vpop.f32.mrf.mxu1 }
  0xeb   : > { %v995_v28 = vpop.eup %994  ;;  %v629_v29 = vpop.f32.mrf.mxu0 }
  0xec   : > { %v997_v30 = vpop.eup %996  ;;  %v630_v31 = vadd.f32 %v629_v29, %v1163_v4  ;;  %v670_v32 = vpop.f32.mrf.mxu1 }
  0xed   : > { %v999_v33 = vpop.eup %998  ;;  %v671_v34 = vadd.f32 %v670_v32, %v1163_v4  ;;  %v631_v35 = vpop.f32.mrf.mxu0 }
  0xee   : > { %v1001_v36 = vpop.eup %1000  ;;  %v791_v37 = vcombine.low %v995_v28, %v999_v33  ;;  %1010 = vtanh.f32 %v630_v31  ;;  %v632_v38 = vadd.f32 %v631_v35, %v1163_v4  ;;  %v672_v39 = vpop.f32.mrf.mxu1 }
  0xef   : > { %v792_v40 = vcombine.low %v997_v30, %v1001_v36  ;;  %1012 = vtanh.f32 %v671_v34  ;;  %v673_v41 = vadd.f32 %v672_v39, %v1163_v4  ;;  %v633_v42 = vpop.f32.mrf.mxu0 }
  0xf0   : > { %807 = vst [vmem:[%s1178_s29] sm:$0x77] %v791_v37  ;;  %1014 = vtanh.f32 %v632_v38  ;;  %v674_v43 = vpop.f32.mrf.mxu1 }
  0xf1   : > { %808 = vst [vmem:[%s1178_s29 + $0x8] sm:$0x77] %v792_v40  ;;  %1016 = vtanh.f32 %v673_v41  ;;  %v634_v44 = vpop.f32.mrf.mxu0 }
  0xf2   : > { %v675_v45 = vpop.f32.mrf.mxu1 }
  0xf3   : > { %v1003_v46 = vpop.eup %1002  ;;  %v711_v47 = vpop.f32.mrf.mxu0 }
  0xf4   : > { %v1005_v48 = vpop.eup %1004  ;;  %v712_v49 = vadd.f32 %v711_v47, %v1163_v4  ;;  %v752_v50 = vpop.f32.mrf.mxu1 }
  0xf5   : > { %v1007_v51 = vpop.eup %1006  ;;  %v753_v52 = vadd.f32 %v752_v50, %v1163_v4  ;;  %v713_v53 = vpop.f32.mrf.mxu0 }
  0xf6   : > { %v1009_v54 = vpop.eup %1008  ;;  %v793_v55 = vcombine.low %v1003_v46, %v1007_v51  ;;  %1018 = vtanh.f32 %v712_v49  ;;  %v714_v56 = vadd.f32 %v713_v53, %v1163_v4  ;;  %v754_v57 = vpop.f32.mrf.mxu1 }
  0xf7   : > { %v794_v58 = vcombine.low %v1005_v48, %v1009_v54  ;;  %1020 = vtanh.f32 %v753_v52  ;;  %v755_v59 = vadd.f32 %v754_v57, %v1163_v4  ;;  %v715_v60 = vpop.f32.mrf.mxu0 }
  0xf8   : > { %809 = vst [vmem:[%s1178_s29 + $0x10] sm:$0x77] %v793_v55  ;;  %1022 = vtanh.f32 %v714_v56  ;;  %v756_v61 = vpop.f32.mrf.mxu1 }
  0xf9   : > { %810 = vst [vmem:[%s1178_s29 + $0x18] sm:$0x77] %v794_v58  ;;  %1024 = vtanh.f32 %v755_v59  ;;  %v716_v62 = vpop.f32.mrf.mxu0 }
  0xfa   : > { %v757_v63 = vpop.f32.mrf.mxu1 }
  0xfb   : > { %v1011_v0 = vpop.eup %1010 }
  0xfc   : > { %v1013_v2 = vpop.eup %1012 }
  0xfd   : > { %v1015_v3 = vpop.eup %1014 }
  0xfe   : > { %v1017_v5 = vpop.eup %1016  ;;  %v795_v6 = vcombine.low %v1011_v0, %v1015_v3 }
  0xff   : > { %v796_v7 = vcombine.low %v1013_v2, %v1017_v5 }
 0x100   : > { %811 = vst [vmem:[%s1178_s29 + $0x20] sm:$0x77] %v795_v6 }
 0x101   : > { %812 = vst [vmem:[%s1178_s29 + $0x28] sm:$0x77] %v796_v7 }
 0x103   : > { %v1019_v4 = vpop.eup %1018 }
 0x104   : > { %v1021_v8 = vpop.eup %1020 }
 0x105   : > { %v1023_v9 = vpop.eup %1022 }
 0x106   : > { %v1025_v10 = vpop.eup %1024  ;;  %v797_v1 = vcombine.low %v1019_v4, %v1023_v9 }
 0x107   : > { %v798_v11 = vcombine.low %v1021_v8, %v1025_v10 }
 0x108   : > { %813 = vst [vmem:[%s1178_s29 + $0x30] sm:$0x77] %v797_v1 }
 0x109   : > { %814 = vst [vmem:[%s1178_s29 + $0x38] sm:$0x77] %v798_v11 }
 0x10a PF: > { %s13_s14 = sadd.s32 1, %s1048_s14   ;;  %s1208_s12 = smov %s1044_s13 }
 0x10b   : > { %p10_p5 = scmp.ge.s32.totalorder %s13_s14, 6   ;;  %s1209_s13 = smov %s1211_s15 }
 0x10d   :  { %12 = sbr.rel (!%p10_p5) target bundleno = 2 (0x2), region = 65 }

</bundles_post_ra>
